<compile_context>
chip_gen: v7x
topology: tpu7x:2x2x1
jax: 0.10.0
libtpu: 0.0.40
codegen_flags: <defaults>
</compile_context>

<pallas_src>
import functools

import jax
import jax.numpy as jnp
from jax import lax
from jax.experimental import pallas as pl
from jax.experimental.pallas import tpu as pltpu

SCALE_WEIGHT = 0.5 ** 0.5
LANE = 128


# ----------------------------- Pallas kernel -------------------------------

def stacked_gated_conv_kernel(x_ref, w_ref, b_ref, o_ref, xpad_ref, *,
                              num_layers, L, C, K, pad):
    """Full StackedCNN forward for one batch row; activation stays on-chip.

    x_ref   : (1, L, C)              f32   input sequence (channels = lanes)
    w_ref   : (num_layers, K*C, 2C)  bf16  fused im2col taps  (out | gate)
    b_ref   : (num_layers, 1, 2C)    f32   fused bias         (out | gate)
    o_ref   : (1, L, C)              f32   output
    xpad_ref: (L + 2*pad, C)         bf16  persistent zero-halo activation copy
    """
    # Zero the conv halo rows. Done every grid step (cheap: `pad` rows each
    # side) rather than only at program_id==0, because with a "parallel" batch
    # axis a second TensorCore may start at a nonzero grid index with
    # uninitialized scratch.
    xpad_ref[:pad, :] = jnp.zeros((pad, C), jnp.bfloat16)
    xpad_ref[pad + L:, :] = jnp.zeros((pad, C), jnp.bfloat16)

    def layer_body(layer, x):
        # x: (L, C) f32 resident activation (loop carry, never leaves the chip).
        # One bf16 cast of the activation per layer, written into the padded
        # scratch; the K shifted im2col windows are read from the bf16 copy.
        xpad_ref[pad:pad + L, :] = x.astype(jnp.bfloat16)
        xb = xpad_ref[...]                                      # (L+2p, C) bf16
        xcol = jnp.concatenate([xb[k:k + L] for k in range(K)],
                               axis=-1)                         # (L, K*C) bf16

        # Single fused bf16 MXU matmul per layer (out and gate halves
        # together), f32 accumulate; the split is a lane-tile-aligned slice.
        acc = jnp.dot(xcol, w_ref[layer],
                      preferred_element_type=jnp.float32) + b_ref[layer]
        out, gate = acc[:, :C], acc[:, C:]

        # Exact sigmoid via a single tanh (one EUP push, bounded intermediate).
        y = out * (0.5 * jnp.tanh(0.5 * gate) + 0.5)
        return (x + y) * SCALE_WEIGHT                           # f32 residual

    x = x_ref[0]
    if num_layers <= 8:
        # Full unroll (== lax.fori_loop(..., unroll=True) for static bounds):
        # the LLO scheduler sees across layer boundaries, so layer l+1's weight
        # reads / MXU pushes overlap layer l's gating epilogue.
        for layer in range(num_layers):
            x = layer_body(layer, x)
    else:
        # Deep stacks: partial unroll keeps code size bounded.
        x = lax.fori_loop(0, num_layers, layer_body, x, unroll=2)
    o_ref[0] = x.astype(o_ref.dtype)


def stacked_cnn_fused(x_nlc, w, b, width):
    """x_nlc: (N, L, C) f32, C % 128 == 0. w: (nl, K*C, 2C) bf16. b: (nl, 1, 2C)."""
    N, L, C = x_nlc.shape
    nl, KC, C2 = w.shape
    K = width
    pad = K // 2
    assert KC == K * C and C2 == 2 * C

    kernel = functools.partial(stacked_gated_conv_kernel,
                               num_layers=nl, L=L, C=C, K=K, pad=pad)

    # Actual resident VMEM: single-buffered weight/bias stacks, double-buffered
    # x/o tiles, the bf16 padded-activation scratch, and per-layer temporaries.
    resident = (nl * (K * C) * (2 * C) * 2        # bf16 fused weight stack
                + nl * 2 * C * 4                  # f32 fused bias
                + 4 * L * C * 4                   # x + o tiles, double-buffered
                + (L + 2 * pad) * C * 2           # bf16 padded scratch
                + L * K * C * 2                   # xcol
                + 4 * L * 2 * C * 4)              # acc / out / gate / carry
    vmem_limit = int(min(100 * 1024 * 1024,
                         max(2 * resident, 16 * 1024 * 1024)))

    cost = pl.CostEstimate(
        flops=2 * N * nl * L * (K * C) * (2 * C),   # one fused dot per layer
        transcendentals=N * nl * L * C,             # one tanh per gate element
        bytes_accessed=(2 * N * L * C * 4           # x in + out (f32)
                        + nl * (K * C) * (2 * C) * 2
                        + nl * 2 * C * 4))

    # TODO(synk): at production sizes (C~512, 15+ layers, long L) keep the
    # weight stack in HBM (memory_space=pl.ANY) and double-buffer one layer's
    # (K*C, 2C) slab via pltpu.make_async_copy inside layer_body, and tile L
    # (extra "parallel" grid axis, nl*pad halo with redundant edge compute) so
    # per-step temporaries fit v7x's 64 MiB VMEM; at these resident sizes a
    # single L block with resident weights is the fast path.
    return pl.pallas_call(
        kernel,
        out_shape=jax.ShapeDtypeStruct((N, L, C), x_nlc.dtype),
        grid_spec=pltpu.PrefetchScalarGridSpec(
            num_scalar_prefetch=0,
            grid=(N,),                              # batch axis; parallel -> v7x 2 TCs
            in_specs=[
                pl.BlockSpec((1, L, C), lambda n: (n, 0, 0)),
                # Constant block index -> DMA'd once and stays resident;
                # Buffered(1) drops the useless second pipeline buffer
                # (halves resident weight VMEM).
                pl.BlockSpec((nl, K * C, 2 * C), lambda n: (0, 0, 0),
                             pipeline_mode=pl.Buffered(1)),
                pl.BlockSpec((nl, 1, 2 * C), lambda n: (0, 0, 0),
                             pipeline_mode=pl.Buffered(1)),
            ],
            out_specs=pl.BlockSpec((1, L, C), lambda n: (n, 0, 0)),
            scratch_shapes=[pltpu.VMEM((L + 2 * pad, C), jnp.bfloat16)],
        ),
        compiler_params=pltpu.CompilerParams(
            dimension_semantics=("parallel",),
            vmem_limit_bytes=vmem_limit),
        # Safe: the wrapper always hands in a fresh transposed / channel-padded
        # copy of the caller's array, never the caller's own buffer.
        input_output_aliases={0: 0},
        cost_estimate=cost,
    )(x_nlc, w, b)


# ------------------------------ JAX glue ------------------------------------

def pack_params(params, width, lane_multiple=LANE):
    """Per-layer (V, g, b) -> fused, channel-padded im2col weight stack.

    V: (2C, C, K, 1) OIHW, g/b: (2C,).  Returns
      w : (num_layers, K*Cp, 2*Cp) bf16   (columns [:Cp]="out", [Cp:]="gate")
      b : (num_layers, 1, 2*Cp)    f32
      Cp: channels padded up to a multiple of `lane_multiple` for lane-dense
          stores / full MXU tiles; padded channels stay exactly zero.
    """
    K = width
    C = params[0][0].shape[1]
    Cp = ((C + lane_multiple - 1) // lane_multiple) * lane_multiple
    ws, bs = [], []
    for (V, g, b) in params:
        OC = V.shape[0]                                         # 2C
        norm = jnp.sqrt(jnp.sum(V.reshape(OC, -1) ** 2, axis=1))
        wn = (g / norm)[:, None, None, None] * V                # (2C, C, K, 1)
        taps = jnp.transpose(wn[..., 0], (2, 1, 0))             # (K, C, 2C)
        wp = jnp.zeros((K, Cp, 2 * Cp), jnp.float32)
        wp = wp.at[:, :C, :C].set(taps[:, :, :C])               # "out"  half
        wp = wp.at[:, :C, Cp:Cp + C].set(taps[:, :, C:])        # "gate" half
        ws.append(wp.reshape(K * Cp, 2 * Cp))
        bp = jnp.zeros((1, 2 * Cp), jnp.float32)
        bp = bp.at[0, :C].set(b[:C])
        bp = bp.at[0, Cp:Cp + C].set(b[C:])
        bs.append(bp)
    return (jnp.stack(ws).astype(jnp.bfloat16),
            jnp.stack(bs).astype(jnp.float32),
            Cp)


def stacked_cnn_forward(x_nchw, params, width=3):
    """x_nchw: (N, C, L, 1)  ->  (N, C, L, 1). Eval-mode forward."""
    N, C, L, _ = x_nchw.shape
    x = jnp.transpose(x_nchw[..., 0], (0, 2, 1))                # (N, L, C)
    w, b, Cp = pack_params(params, width)
    if Cp != C:
        x = jnp.pad(x, ((0, 0), (0, 0), (0, Cp - C)))           # lane-dense pad
    y = stacked_cnn_fused(x, w, b, width)
    y = y[..., :C]                                              # drop padding
    return jnp.transpose(y, (0, 2, 1))[..., None]               # back to NCHW


def init_params(key, num_layers, input_size, width=3, dropout=0.2):
    """Deterministic synthetic params matching WeightNormConv2d shapes."""
    gain = (4.0 * (1.0 - dropout)) ** 0.5
    fan_in = input_size * width * 1
    fan_out = 2 * input_size * width * 1
    limit = gain * (6.0 / (fan_in + fan_out)) ** 0.5             # xavier_uniform_
    params = []
    for _ in range(num_layers):
        key, k1, k2, k3 = jax.random.split(key, 4)
        V = jax.random.uniform(k1, (2 * input_size, input_size, width, 1),
                               jnp.float32, -limit, limit)
        g = 1.0 + 0.01 * jax.random.normal(k2, (2 * input_size,), jnp.float32)
        b = 0.1 * jax.random.normal(k3, (2 * input_size,), jnp.float32)
        params.append((V, g, b))
    return params


# -------------------------- pure-JAX reference ------------------------------

def stacked_cnn_reference(x_nchw, params, width=3, mxu_dtype=None):
    """f32 reference; mxu_dtype=bf16 mirrors the kernel's MXU input rounding."""
    pad = width // 2
    x = x_nchw
    for (V, g, b) in params:
        OC = V.shape[0]
        norm = jnp.sqrt(jnp.sum(V.reshape(OC, -1) ** 2, axis=1))
        w = (g / norm)[:, None, None, None] * V
        xin = x
        if mxu_dtype is not None:
            w = w.astype(mxu_dtype).astype(jnp.float32)
            xin = x.astype(mxu_dtype).astype(jnp.float32)
        y = lax.conv_general_dilated(
            xin, w, window_strides=(1, 1), padding=((pad, pad), (0, 0)),
            dimension_numbers=("NCHW", "OIHW", "NCHW"))
        y = y + b[None, :, None, None]
        out, gate = y[:, :OC // 2], y[:, OC // 2:]
        x = (x + out * jax.nn.sigmoid(gate)) * SCALE_WEIGHT
    return x


# --------------------------------- main --------------------------------------

if __name__ == "__main__":
    num_layers = 3
    input_size = 32        # channels C (padded to 128 lanes inside the glue)
    width = 3              # cnn_kernel_width
    N, L = 2, 8            # batch, sequence length

    key = jax.random.PRNGKey(0)
    key, kx = jax.random.split(key)
    x = jax.random.normal(kx, (N, input_size, L, 1), jnp.float32)  # NCHW, W=1

    params = init_params(key, num_layers, input_size, width=width, dropout=0.2)

    out = jax.block_until_ready(stacked_cnn_forward(x, params, width=width))
    assert out.shape == x.shape

    # Tight check vs. a reference mirroring the kernel's bf16 MXU inputs
    # (remaining diff: f32 accumulation order only; sigmoid is now exact).
    ref_mxu = jax.block_until_ready(
        stacked_cnn_reference(x, params, width=width, mxu_dtype=jnp.bfloat16))
    assert jnp.allclose(out, ref_mxu, atol=5e-2, rtol=5e-2), (
        float(jnp.max(jnp.abs(out - ref_mxu))))

    # Sanity check vs. the exact f32 module semantics (loose tolerance because
    # the kernel intentionally feeds the MXU bf16 inputs).
    ref_f32 = jax.block_until_ready(
        stacked_cnn_reference(x, params, width=width))
    assert jnp.allclose(out, ref_f32, atol=1e-1, rtol=1e-1), (
        float(jnp.max(jnp.abs(out - ref_f32))))

    print("KERNEL_OK")
</pallas_src>

<mosaic_0001>
module attributes {stable_mosaic.version = 11 : i64} {
  func.func @stacked_gated_conv_kernel(%arg0: i32, %arg1: memref<1x8x128xf32, #tpu.memory_space<vmem>>, %arg2: memref<3x384x256xbf16, #tpu.memory_space<vmem>>, %arg3: memref<3x1x256xf32, #tpu.memory_space<vmem>>, %arg4: memref<1x8x128xf32, #tpu.memory_space<vmem>>, %arg5: memref<10x128xbf16, #tpu.memory_space<vmem>>) attributes {dimension_semantics = [#tpu.dimension_semantics<parallel>], iteration_bounds = array<i64: 2>, scalar_prefetch = 0 : i64, scratch_operands = 1 : i64, tpu.core_type = #tpu.core_type<tc>, window_params = [{transform_indices = @transform_0, window_bounds = array<i64: 1, 8, 128>}, {pipeline_mode = #tpu.pipeline_mode<synchronous>, transform_indices = @transform_1, window_bounds = array<i64: 3, 384, 256>}, {pipeline_mode = #tpu.pipeline_mode<synchronous>, transform_indices = @transform_2, window_bounds = array<i64: 3, 1, 256>}, {transform_indices = @transform_3, window_bounds = array<i64: 1, 8, 128>}]} {
    %cst = arith.constant 0.000000e+00 : bf16
    %0 = vector.broadcast %cst : bf16 to vector<1x128xbf16>
    %c0 = arith.constant 0 : index
    %c0_0 = arith.constant 0 : index
    %1 = vector.load %arg5[%c0, %c0_0] : memref<10x128xbf16, #tpu.memory_space<vmem>>, vector<1x128xbf16>
    tpu.vector_store %arg5[%c0, %c0_0], %0 {strides = array<i32>} : memref<10x128xbf16, #tpu.memory_space<vmem>>, vector<1x128xbf16>,
    %cst_1 = arith.constant 0.000000e+00 : bf16
    %2 = vector.broadcast %cst_1 : bf16 to vector<1x128xbf16>
    %c9 = arith.constant 9 : index
    %c0_2 = arith.constant 0 : index
    %3 = vector.load %arg5[%c9, %c0_2] : memref<10x128xbf16, #tpu.memory_space<vmem>>, vector<1x128xbf16>
    tpu.vector_store %arg5[%c9, %c0_2], %2 {strides = array<i32>} : memref<10x128xbf16, #tpu.memory_space<vmem>>, vector<1x128xbf16>,
    %c0_3 = arith.constant 0 : index
    %c0_4 = arith.constant 0 : index
    %c0_5 = arith.constant 0 : index
    %4 = vector.load %arg1[%c0_3, %c0_4, %c0_5] : memref<1x8x128xf32, #tpu.memory_space<vmem>>, vector<1x8x128xf32>
    %5 = vector.shape_cast %4 : vector<1x8x128xf32> to vector<8x128xf32>
    %6 = arith.truncf %5 : vector<8x128xf32> to vector<8x128xbf16>
    %c1 = arith.constant 1 : index
    %c0_6 = arith.constant 0 : index
    %7 = vector.load %arg5[%c1, %c0_6] : memref<10x128xbf16, #tpu.memory_space<vmem>>, vector<8x128xbf16>
    tpu.vector_store %arg5[%c1, %c0_6], %6 {strides = array<i32>} : memref<10x128xbf16, #tpu.memory_space<vmem>>, vector<8x128xbf16>,
    %c0_7 = arith.constant 0 : index
    %c0_8 = arith.constant 0 : index
    %8 = vector.load %arg5[%c0_7, %c0_8] : memref<10x128xbf16, #tpu.memory_space<vmem>>, vector<10x128xbf16>
    %9 = vector.extract_strided_slice %8 {offsets = [0, 0], sizes = [8, 128], strides = [1, 1]} : vector<10x128xbf16> to vector<8x128xbf16>
    %10 = vector.extract_strided_slice %8 {offsets = [1, 0], sizes = [8, 128], strides = [1, 1]} : vector<10x128xbf16> to vector<8x128xbf16>
    %11 = vector.extract_strided_slice %8 {offsets = [2, 0], sizes = [8, 128], strides = [1, 1]} : vector<10x128xbf16> to vector<8x128xbf16>
    %12 = tpu.concatenate %9, %10, %11 in 1 : vector<8x128xbf16>, vector<8x128xbf16>, vector<8x128xbf16> -> vector<8x384xbf16>
    %c0_9 = arith.constant 0 : index
    %c0_10 = arith.constant 0 : index
    %c0_11 = arith.constant 0 : index
    %13 = vector.load %arg2[%c0_9, %c0_10, %c0_11] : memref<3x384x256xbf16, #tpu.memory_space<vmem>>, vector<1x384x256xbf16>
    %14 = vector.shape_cast %13 : vector<1x384x256xbf16> to vector<384x256xbf16>
    %cst_12 = arith.constant dense<0.000000e+00> : vector<8x256xf32>
    %15 = tpu.matmul %12, %14, %cst_12 {dimension_numbers = #tpu.dot_dimension_numbers<[1], [0], [0], [1], [0, 0, 1, 1], [], []>} : vector<8x384xbf16>, vector<384x256xbf16>, vector<8x256xf32> -> vector<8x256xf32>
    %c0_13 = arith.constant 0 : index
    %c0_14 = arith.constant 0 : index
    %c0_15 = arith.constant 0 : index
    %16 = vector.load %arg3[%c0_13, %c0_14, %c0_15] : memref<3x1x256xf32, #tpu.memory_space<vmem>>, vector<1x1x256xf32>
    %17 = vector.shape_cast %16 : vector<1x1x256xf32> to vector<1x256xf32>
    %18 = vector.broadcast %17 : vector<1x256xf32> to vector<8x256xf32>
    %19 = arith.addf %15, %18 : vector<8x256xf32>
    %20 = vector.extract_strided_slice %19 {offsets = [0, 0], sizes = [8, 128], strides = [1, 1]} : vector<8x256xf32> to vector<8x128xf32>
    %21 = vector.extract_strided_slice %19 {offsets = [0, 128], sizes = [8, 128], strides = [1, 1]} : vector<8x256xf32> to vector<8x128xf32>
    %cst_16 = arith.constant 5.000000e-01 : f32
    %22 = vector.broadcast %cst_16 : f32 to vector<8x128xf32>
    %23 = arith.mulf %22, %21 : vector<8x128xf32>
    %24 = math.tanh %23 : vector<8x128xf32>
    %cst_17 = arith.constant 5.000000e-01 : f32
    %25 = vector.broadcast %cst_17 : f32 to vector<8x128xf32>
    %26 = arith.mulf %25, %24 : vector<8x128xf32>
    %cst_18 = arith.constant 5.000000e-01 : f32
    %27 = vector.broadcast %cst_18 : f32 to vector<8x128xf32>
    %28 = arith.addf %26, %27 : vector<8x128xf32>
    %29 = arith.mulf %20, %28 : vector<8x128xf32>
    %30 = arith.addf %5, %29 : vector<8x128xf32>
    %cst_19 = arith.constant 0.707106769 : f32
    %31 = vector.broadcast %cst_19 : f32 to vector<8x128xf32>
    %32 = arith.mulf %30, %31 : vector<8x128xf32>
    %33 = arith.truncf %32 : vector<8x128xf32> to vector<8x128xbf16>
    %c1_20 = arith.constant 1 : index
    %c0_21 = arith.constant 0 : index
    %34 = vector.load %arg5[%c1_20, %c0_21] : memref<10x128xbf16, #tpu.memory_space<vmem>>, vector<8x128xbf16>
    tpu.vector_store %arg5[%c1_20, %c0_21], %33 {strides = array<i32>} : memref<10x128xbf16, #tpu.memory_space<vmem>>, vector<8x128xbf16>,
    %c0_22 = arith.constant 0 : index
    %c0_23 = arith.constant 0 : index
    %35 = vector.load %arg5[%c0_22, %c0_23] : memref<10x128xbf16, #tpu.memory_space<vmem>>, vector<10x128xbf16>
    %36 = vector.extract_strided_slice %35 {offsets = [0, 0], sizes = [8, 128], strides = [1, 1]} : vector<10x128xbf16> to vector<8x128xbf16>
    %37 = vector.extract_strided_slice %35 {offsets = [1, 0], sizes = [8, 128], strides = [1, 1]} : vector<10x128xbf16> to vector<8x128xbf16>
    %38 = vector.extract_strided_slice %35 {offsets = [2, 0], sizes = [8, 128], strides = [1, 1]} : vector<10x128xbf16> to vector<8x128xbf16>
    %39 = tpu.concatenate %36, %37, %38 in 1 : vector<8x128xbf16>, vector<8x128xbf16>, vector<8x128xbf16> -> vector<8x384xbf16>
    %c1_24 = arith.constant 1 : index
    %c0_25 = arith.constant 0 : index
    %c0_26 = arith.constant 0 : index
    %40 = vector.load %arg2[%c1_24, %c0_25, %c0_26] : memref<3x384x256xbf16, #tpu.memory_space<vmem>>, vector<1x384x256xbf16>
    %41 = vector.shape_cast %40 : vector<1x384x256xbf16> to vector<384x256xbf16>
    %cst_27 = arith.constant dense<0.000000e+00> : vector<8x256xf32>
    %42 = tpu.matmul %39, %41, %cst_27 {dimension_numbers = #tpu.dot_dimension_numbers<[1], [0], [0], [1], [0, 0, 1, 1], [], []>} : vector<8x384xbf16>, vector<384x256xbf16>, vector<8x256xf32> -> vector<8x256xf32>
    %c1_28 = arith.constant 1 : index
    %c0_29 = arith.constant 0 : index
    %c0_30 = arith.constant 0 : index
    %43 = vector.load %arg3[%c1_28, %c0_29, %c0_30] : memref<3x1x256xf32, #tpu.memory_space<vmem>>, vector<1x1x256xf32>
    %44 = vector.shape_cast %43 : vector<1x1x256xf32> to vector<1x256xf32>
    %45 = vector.broadcast %44 : vector<1x256xf32> to vector<8x256xf32>
    %46 = arith.addf %42, %45 : vector<8x256xf32>
    %47 = vector.extract_strided_slice %46 {offsets = [0, 0], sizes = [8, 128], strides = [1, 1]} : vector<8x256xf32> to vector<8x128xf32>
    %48 = vector.extract_strided_slice %46 {offsets = [0, 128], sizes = [8, 128], strides = [1, 1]} : vector<8x256xf32> to vector<8x128xf32>
    %cst_31 = arith.constant 5.000000e-01 : f32
    %49 = vector.broadcast %cst_31 : f32 to vector<8x128xf32>
    %50 = arith.mulf %49, %48 : vector<8x128xf32>
    %51 = math.tanh %50 : vector<8x128xf32>
    %cst_32 = arith.constant 5.000000e-01 : f32
    %52 = vector.broadcast %cst_32 : f32 to vector<8x128xf32>
    %53 = arith.mulf %52, %51 : vector<8x128xf32>
    %cst_33 = arith.constant 5.000000e-01 : f32
    %54 = vector.broadcast %cst_33 : f32 to vector<8x128xf32>
    %55 = arith.addf %53, %54 : vector<8x128xf32>
    %56 = arith.mulf %47, %55 : vector<8x128xf32>
    %57 = arith.addf %32, %56 : vector<8x128xf32>
    %cst_34 = arith.constant 0.707106769 : f32
    %58 = vector.broadcast %cst_34 : f32 to vector<8x128xf32>
    %59 = arith.mulf %57, %58 : vector<8x128xf32>
    %60 = arith.truncf %59 : vector<8x128xf32> to vector<8x128xbf16>
    %c1_35 = arith.constant 1 : index
    %c0_36 = arith.constant 0 : index
    %61 = vector.load %arg5[%c1_35, %c0_36] : memref<10x128xbf16, #tpu.memory_space<vmem>>, vector<8x128xbf16>
    tpu.vector_store %arg5[%c1_35, %c0_36], %60 {strides = array<i32>} : memref<10x128xbf16, #tpu.memory_space<vmem>>, vector<8x128xbf16>,
    %c0_37 = arith.constant 0 : index
    %c0_38 = arith.constant 0 : index
    %62 = vector.load %arg5[%c0_37, %c0_38] : memref<10x128xbf16, #tpu.memory_space<vmem>>, vector<10x128xbf16>
    %63 = vector.extract_strided_slice %62 {offsets = [0, 0], sizes = [8, 128], strides = [1, 1]} : vector<10x128xbf16> to vector<8x128xbf16>
    %64 = vector.extract_strided_slice %62 {offsets = [1, 0], sizes = [8, 128], strides = [1, 1]} : vector<10x128xbf16> to vector<8x128xbf16>
    %65 = vector.extract_strided_slice %62 {offsets = [2, 0], sizes = [8, 128], strides = [1, 1]} : vector<10x128xbf16> to vector<8x128xbf16>
    %66 = tpu.concatenate %63, %64, %65 in 1 : vector<8x128xbf16>, vector<8x128xbf16>, vector<8x128xbf16> -> vector<8x384xbf16>
    %c2 = arith.constant 2 : index
    %c0_39 = arith.constant 0 : index
    %c0_40 = arith.constant 0 : index
    %67 = vector.load %arg2[%c2, %c0_39, %c0_40] : memref<3x384x256xbf16, #tpu.memory_space<vmem>>, vector<1x384x256xbf16>
    %68 = vector.shape_cast %67 : vector<1x384x256xbf16> to vector<384x256xbf16>
    %cst_41 = arith.constant dense<0.000000e+00> : vector<8x256xf32>
    %69 = tpu.matmul %66, %68, %cst_41 {dimension_numbers = #tpu.dot_dimension_numbers<[1], [0], [0], [1], [0, 0, 1, 1], [], []>} : vector<8x384xbf16>, vector<384x256xbf16>, vector<8x256xf32> -> vector<8x256xf32>
    %c2_42 = arith.constant 2 : index
    %c0_43 = arith.constant 0 : index
    %c0_44 = arith.constant 0 : index
    %70 = vector.load %arg3[%c2_42, %c0_43, %c0_44] : memref<3x1x256xf32, #tpu.memory_space<vmem>>, vector<1x1x256xf32>
    %71 = vector.shape_cast %70 : vector<1x1x256xf32> to vector<1x256xf32>
    %72 = vector.broadcast %71 : vector<1x256xf32> to vector<8x256xf32>
    %73 = arith.addf %69, %72 : vector<8x256xf32>
    %74 = vector.extract_strided_slice %73 {offsets = [0, 0], sizes = [8, 128], strides = [1, 1]} : vector<8x256xf32> to vector<8x128xf32>
    %75 = vector.extract_strided_slice %73 {offsets = [0, 128], sizes = [8, 128], strides = [1, 1]} : vector<8x256xf32> to vector<8x128xf32>
    %cst_45 = arith.constant 5.000000e-01 : f32
    %76 = vector.broadcast %cst_45 : f32 to vector<8x128xf32>
    %77 = arith.mulf %76, %75 : vector<8x128xf32>
    %78 = math.tanh %77 : vector<8x128xf32>
    %cst_46 = arith.constant 5.000000e-01 : f32
    %79 = vector.broadcast %cst_46 : f32 to vector<8x128xf32>
    %80 = arith.mulf %79, %78 : vector<8x128xf32>
    %cst_47 = arith.constant 5.000000e-01 : f32
    %81 = vector.broadcast %cst_47 : f32 to vector<8x128xf32>
    %82 = arith.addf %80, %81 : vector<8x128xf32>
    %83 = arith.mulf %74, %82 : vector<8x128xf32>
    %84 = arith.addf %59, %83 : vector<8x128xf32>
    %cst_48 = arith.constant 0.707106769 : f32
    %85 = vector.broadcast %cst_48 : f32 to vector<8x128xf32>
    %86 = arith.mulf %84, %85 : vector<8x128xf32>
    %c0_49 = arith.constant 0 : index
    %c0_50 = arith.constant 0 : index
    %c0_51 = arith.constant 0 : index
    %87 = vector.load %arg4[%c0_49, %c0_50, %c0_51] : memref<1x8x128xf32, #tpu.memory_space<vmem>>, vector<1x8x128xf32>
    %88 = vector.shape_cast %87 : vector<1x8x128xf32> to vector<8x128xf32>
    %89 = vector.shape_cast %86 : vector<8x128xf32> to vector<1x8x128xf32>
    tpu.vector_store %arg4[%c0_49, %c0_50, %c0_51], %89 {strides = array<i32>} : memref<1x8x128xf32, #tpu.memory_space<vmem>>, vector<1x8x128xf32>,
    return
  }
  func.func @transform_0(%arg0: i32) -> (i32, i32, i32) {
    %c0_i32 = arith.constant 0 : i32
    %c0_i32_0 = arith.constant 0 : i32
    %c0_i32_1 = arith.constant 0 : i32
    return %arg0, %c0_i32, %c0_i32_0 : i32, i32, i32
  }
  func.func @transform_1(%arg0: i32) -> (i32, i32, i32) {
    %c0_i32 = arith.constant 0 : i32
    %c0_i32_0 = arith.constant 0 : i32
    %c0_i32_1 = arith.constant 0 : i32
    %c0_i32_2 = arith.constant 0 : i32
    return %c0_i32, %c0_i32_0, %c0_i32_1 : i32, i32, i32
  }
  func.func @transform_2(%arg0: i32) -> (i32, i32, i32) {
    %c0_i32 = arith.constant 0 : i32
    %c0_i32_0 = arith.constant 0 : i32
    %c0_i32_1 = arith.constant 0 : i32
    %c0_i32_2 = arith.constant 0 : i32
    return %c0_i32, %c0_i32_0, %c0_i32_1 : i32, i32, i32
  }
  func.func @transform_3(%arg0: i32) -> (i32, i32, i32) {
    %c0_i32 = arith.constant 0 : i32
    %c0_i32_0 = arith.constant 0 : i32
    %c0_i32_1 = arith.constant 0 : i32
    return %arg0, %c0_i32, %c0_i32_0 : i32, i32, i32
  }
}

</mosaic_0001>

<bundles_post_ra>
// kernel: tpu_custom_call.1
= control target key start
LH: loop header
LB: loop body
LE: loop exit
PB: predicated region body
PF: predicated region fallthrough
CT: control target
= control target key end

     0   :  { %8 = vsyncpa [#allocation4], 0  ;;  %s2497_s0 = inlined_call_operand.hbm [shape: f32[2,8,128], index: 0, kind: input, shape index: {}, may-alias: {0,3}]   ;;  %s2498_s1 = inlined_call_operand.hbm [shape: bf16[3,384,256], index: 1, kind: input, shape index: {}]   ;;  %s2499_s2 = inlined_call_operand.vmem [shape: f32[3,1,256], index: 2, kind: input, shape index: {}]   ;;  %s2500_s3 = inlined_call_operand.hbm [shape: f32[2,8,128], index: 3, kind: output, shape index: {}, may-alias: {0,3}]  }
   0x1   :  { %10 = vsyncpa [#allocation4 + $0x1], 0 }
   0x2   :  { %11 = vsyncpa [#allocation7], 0 }
   0x3   :  { %12 = vsyncpa [#allocation5], 0 }
   0x4   :  { %14 = vsyncpa [#allocation5 + $0x1], 0  ;;  %s2217_s12 = smov 0   ;;  %s2219_s13 = smov 0  }
   0x5   :  { %s2221_s14 = smov 0   ;;  %s2223_s15 = smov 0  }
   0x6 LB: > { %s2238_s16 = sadd.s32 4294967295, %s2189_s15   ;;  %s1591_s17 = sadd.s32 4294967294, %s2189_s15   ;;  %s2189_s15 = sphi %s2223_s15, %s2526_s15   ;;  %s2185_s14 = sphi %s2221_s14, %s2525_s14   ;;  %s2181_s13 = sphi %s2219_s13, %s2524_s13   ;;  %s2177_s12 = sphi %s2217_s12, %s2523_s12  }
   0x7   : > { %p40_p0 = scmp.ne.s32.totalorder %s2181_s13, %s2177_s12  ;;  %p2501_p1 = scmp.eq.s32.totalorder %s2238_s16, 0 }
   0x8   : > { %p112_p3 = scmp.eq.s32.totalorder %s1591_s17, 1  ;;  %p1592_p5 = scmp.ge.s32.totalorder %s2189_s15, 1 }
   0x9   : > { %p2247_p4 = por %p2501_p1, %p40_p0  ;;  %p119_p7 = scmp.lt.s32.totalorder %s2189_s15, 3 }
   0xa   : > { %p2252_p6 = por %p112_p3, %p40_p0  ;;  %s2191_s21 = smov [#allocation6]  }
   0xb   : > { %s2504_s18 = scalar_select %p2247_p4, 1, 0 }
   0xc   : > { %s2505_s19 = scalar_select %p2252_p6, 1, 0 }
   0xd   : > { %p2257_p8 = pnand %p1592_p5, %p119_p7  ;;  %s131_s22 = sshll.u32 %s2191_s21, 4  ;;  %s2261_s22 = int_to_ptr.vmem [resolvable:$true] %s131_s22 }
   0xe   : > { %s2273_s24 = sadd.s32 1, %s2189_s15   ;;  %s27_s25 = sadd.s32 1, %s2185_s14 }
   0xf   : > { %s2506_s20 = scalar_select %p2257_p8, 1, 0 }
  0x10   : > { %p1784_p9 = pneg %p2257_p8  ;;  %s24_s26 = ssub.s32 %s2189_s15, %s2273_s24 }
  0x11   : > { %s2061_s29 = scalar_lea.hbm %s2498_s1, 18432 }
  0x12   : > { %p2268_p11 = pnand %p1784_p9, %p2501_p1  ;;  %p2062_p12 = scmp.ne.s32.totalorder %s2498_s1, %s2061_s29 }
  0x13   : > { %p2068_p5 = scmp.lt.u32.totalorder %s2061_s29, %s2498_s1 }
  0x14   : > { %p2063_p13 = pneg %p2268_p11 }
  0x16   : > { %p2064_p0 = pnand %p2063_p13, %p2062_p12 }
  0x18   : > { %p2065_p3 = pneg %p2064_p0 }
  0x1a   : > { %p2070_p7 = pnand %p2068_p5, %p2065_p3 }
  0x1c   : > { %2073 = shalt.err (!%p2070_p7)
}
  0x1d   : > { %s2074_s7 = scalar_lea.vmem %s2261_s22, 18432  ;;  %p2082_p2 = scmp.lt.s32.totalorder %s2261_s22, %s2261_s22 }
  0x1e   : > { %p2075_p9 = scmp.ne.s32.totalorder %s2261_s22, %s2074_s7  ;;  %p2083_p6 = scmp.lt.s32.totalorder %s2074_s7, %s2074_s7 }
  0x20   : > { %p2077_p10 = pnand %p2075_p9, %p2063_p13  ;;  %p2084_p4 = por %p2083_p6, %p2082_p2 }
  0x22   : > { %p2078_p1 = pneg %p2077_p10 }
  0x24   : > { %p2085_p8 = pnand %p2084_p4, %p2078_p1 }
  0x26   : > { %2088 = shalt.err (!%p2085_p8)
}
  0x27   : > { %s2192_s8 = smov 128   ;;  %s2193_s9 = smov 8  }
  0x28   : > { %1787 = dma.hbm_to_vmem [thread:$0]  (!%p2268_p11), %s2498_s1, 18432, %s2261_s22, [#allocation7], %s2192_s8, %s2192_s8, %s2193_s9  }
  0x29   : > { %p25_p2 = scmp.eq.s32.totalorder %s24_s26, 0  ;;  %p34_p1 = scmp.ne.s32.totalorder %s2185_s14, %s2181_s13 }
  0x2a   : > { %p35_p4 = scmp.eq.s32.totalorder %s2189_s15, 0  ;;  %p1797_p6 = scmp.lt.s32.totalorder %s2189_s15, 2 }
  0x2b   : > { %s2304_s17 = scalar_select %p25_p2, %s2185_s14, %s27_s25  }
  0x2c   : > { %p36_p8 = por %p35_p4, %p34_p1  ;;  %p2508_p10 = scmp.eq.s32.totalorder %s2238_s16, 1 }
  0x2d   : > { %s148_s27 = sand.u32 1, %s2185_s14   ;;  %s1596_s28 = sshll.u32 %s2189_s15, 7 }
  0x2e   : > { %p2308_p12 = por %p2508_p10, %p34_p1  ;;  %s1595_s29 = sshll.u32 %s148_s27, 3 }
  0x2f   : > { %s2317_s4 = scalar_lea.hbm %s2497_s0, %s1596_s28  ;;  %s152_s22 = scalar_lea.vmem [#allocation3], %s1595_s29 }
  0x30   : > { %s159_s25 = sshll.u32 %s152_s22, 4  ;;  %p2319_p11 = pnand %p1797_p6, %p36_p8  ;;  %s2323_s25 = int_to_ptr.vmem [resolvable:$true] %s159_s25 }
  0x31   : > { %s149_s5 = scalar_lea.sflag [#allocation4], %s148_s27  ;;  %s2089_s6 = scalar_lea.hbm %s2317_s4, 128 }
  0x32   : > { %p2090_p13 = scmp.ne.s32.totalorder %s2317_s4, %s2089_s6  ;;  %p2091_p0 = pneg %p2319_p11 }
  0x33   : > { %s2094_s9 = scalar_lea.hbm %s2497_s0, 256  ;;  %p2095_p7 = scmp.lt.u32.totalorder %s2317_s4, %s2497_s0 }
  0x34   : > { %p2092_p3 = pnand %p2091_p0, %p2090_p13  ;;  %p2096_p9 = scmp.lt.u32.totalorder %s2094_s9, %s2089_s6 }
  0x35   : > { %p2098_p1 = scmp.lt.u32.totalorder %s2089_s6, %s2317_s4 }
  0x36   : > { %p2093_p5 = pneg %p2092_p3  ;;  %p2097_p2 = por %p2096_p9, %p2095_p7 }
  0x38   : > { %p2099_p4 = por %p2098_p1, %p2097_p2 }
  0x3a   : > { %p2100_p6 = pnand %p2099_p4, %p2093_p5 }
  0x3c   : > { %2103 = shalt.err (!%p2100_p6)
}
  0x3d   : > { %s2104_s27 = scalar_lea.vmem %s2323_s25, 128  ;;  %s2194_s28 = smov [#allocation3]  }
  0x3e   : > { %p2105_p8 = scmp.ne.s32.totalorder %s2323_s25, %s2104_s27  ;;  %s2109_s29 = sshll.u32 %s2194_s28, 4  ;;  %s2110_s29 = int_to_ptr.vmem [resolvable:$false] %s2109_s29 }
  0x3f   : > { %s2111_s23 = scalar_lea.vmem %s2110_s29, 256  ;;  %p2112_p3 = scmp.lt.s32.totalorder %s2323_s25, %s2110_s29 }
  0x40   : > { %p2107_p10 = pnand %p2105_p8, %p2091_p0  ;;  %p2113_p7 = scmp.lt.s32.totalorder %s2111_s23, %s2104_s27 }
  0x42   : > { %p2108_p13 = pneg %p2107_p10  ;;  %p2114_p9 = por %p2113_p7, %p2112_p3 }
  0x44   : > { %p2115_p2 = pnand %p2114_p9, %p2108_p13 }
  0x46   : > { %2118 = shalt.err (!%p2115_p2)
}
  0x47   : > { %1791 = dma.hbm_to_vmem [thread:$0]  (!%p2319_p11), %s2317_s4, 128, %s2323_s25, %s149_s5  }
  0x48   : > { %p2511_p5 = scmp.ne.s32.totalorder %s2506_s20, 0 }
  0x49   : > { %s2353_s30 = sand.u32 (!%p2511_p5), 1, %s2181_s13   ;;  %p2512_p0 = scmp.ne.s32.totalorder (!%p2511_p5), %s2504_s18, 0 }
  0x4a   : > { %168 = sbr.rel (%p2511_p5) target bundleno = 996 (0x3e4), region = 32  ;;  %s1598_s22 = sshll.u32 (!%p2511_p5), %s2353_s30, 3 }
  0x4b   : > { %s171_s6 = scalar_lea.sflag (!%p2511_p5), [#allocation4], %s2353_s30  ;;  %s2359_s7 = scalar_lea.vmem (!%p2511_p5), [#allocation3], %s1598_s22 }
  0x51   : > { %2164 = dma.done.wait (%p2512_p0), %s171_s6, 128  }
  0x52   : > { %2166 = vsyncadd (%p2512_p0), %s171_s6, 4294967168  ;;  %p2513_p11 = scmp.eq.s32.totalorder %s2238_s16, 0 }
  0x54   : > { %2168 = dma.done.wait (%p2513_p11), [#allocation7], 18432   ;;  %p2514_p1 = pmov %p2513_p11 }
  0x55   : > { %v2195_v0 = vmov 0   ;;  %v1836_v1 = vld [vmem:[#allocation6 + $0x4] ss:$8 sps:$4 sm:$0xff]   ;;  %v1838_v2 = vld [vmem:[#allocation6] ss:$8 sps:$4 sm:$0xff]   ;;  %vm202_vm0 = vcmask 1040384  }
  0x56   : > { %2170 = vsyncadd (%p2514_p1), [#allocation7], 4294948864  ;;  %626 = vmatprep.mubr.bf16.mxu0 %v2195_v0  ;;  %553 = vmatprep.subr.bf16.mxu1 %v1836_v1  ;;  %v1839_v3 = vld [vmem:[#allocation6 + $0x14] ss:$8 sps:$4 sm:$0xff]   ;;  %v1841_v4 = vld [vmem:[#allocation6 + $0x10] ss:$8 sps:$4 sm:$0xff]  }
  0x57   : > { %554 = vmatpush1.bf16.msra.mxu1 %v1838_v2  ;;  %v1842_v5 = vld [vmem:[#allocation6 + $0x24] ss:$8 sps:$4 sm:$0xff]   ;;  %v1844_v6 = vld [vmem:[#allocation6 + $0x20] ss:$8 sps:$4 sm:$0xff]   ;;  %v1845_v7 = vld [vmem:[#allocation6 + $0x34] ss:$8 sps:$4 sm:$0xff]  }
  0x58   : > { %555 = vmatprep.subr.bf16.mxu1 %v1839_v3  ;;  %v1847_v8 = vld [vmem:[#allocation6 + $0x30] ss:$8 sps:$4 sm:$0xff]   ;;  %v1860_v9 = vld [vmem:[#allocation6 + $0x104] ss:$8 sps:$4 sm:$0xff]   ;;  %v1864_v11 = vld [vmem:[#allocation6 + $0x100] ss:$8 sps:$4 sm:$0xff]  }
  0x59   : > { %v1848_v10 = vld [vmem:[#allocation6 + $0x44] ss:$8 sps:$4 sm:$0xff]   ;;  %594 = vmatprep.subr.bf16.mxu0 %v1860_v9  ;;  %v1866_v12 = vld [vmem:[#allocation6 + $0x114] ss:$8 sps:$4 sm:$0xff]   ;;  %v1850_v13 = vld [vmem:[#allocation6 + $0x40] ss:$8 sps:$4 sm:$0xff]  }
  0x5a   : > { %595 = vmatpush1.bf16.msra.mxu0 %v1864_v11  ;;  %v1851_v14 = vld [vmem:[#allocation6 + $0x54] ss:$8 sps:$4 sm:$0xff]   ;;  %v1870_v15 = vld [vmem:[#allocation6 + $0x110] ss:$8 sps:$4 sm:$0xff]   ;;  %v1872_v16 = vld [vmem:[#allocation6 + $0x124] ss:$8 sps:$4 sm:$0xff]  }
  0x5b   : > { %556 = vmatpush1.bf16.msra.mxu1 %v1841_v4  ;;  %596 = vmatprep.subr.bf16.mxu0 %v1866_v12  ;;  %v1853_v17 = vld [vmem:[#allocation6 + $0x50] ss:$8 sps:$4 sm:$0xff]   ;;  %v1876_v18 = vld [vmem:[#allocation6 + $0x120] ss:$8 sps:$4 sm:$0xff]   ;;  %v1878_v19 = vld [vmem:[#allocation6 + $0x134] ss:$8 sps:$4 sm:$0xff]  }
  0x5c   : > { %557 = vmatprep.subr.bf16.mxu1 %v1842_v5  ;;  %v1854_v20 = vld [vmem:[#allocation6 + $0x64] ss:$8 sps:$4 sm:$0xff]   ;;  %v1882_v21 = vld [vmem:[#allocation6 + $0x130] ss:$8 sps:$4 sm:$0xff]   ;;  %v1856_v22 = vld [vmem:[#allocation6 + $0x60] ss:$8 sps:$4 sm:$0xff]  }
  0x5d   : > { %v1884_v23 = vld [vmem:[#allocation6 + $0x144] ss:$8 sps:$4 sm:$0xff]   ;;  %v1857_v24 = vld [vmem:[#allocation6 + $0x74] ss:$8 sps:$4 sm:$0xff]   ;;  %vm203_vm1 = vsmask.f32 256 }
  0x5e   : > { %597 = vmatpush1.bf16.msra.mxu0 %v1870_v15  ;;  %vm208_vm2 = vsmask.f32 7938  ;;  %v1859_v25 = vld [vmem:[#allocation6 + $0x70] ss:$8 sps:$4 sm:$0xff]   ;;  %v1888_v26 = vld [vmem:[#allocation6 + $0x140] ss:$8 sps:$4 sm:$0xff]   ;;  %vm2370_vm3 = vmand %vm202_vm0, %vm203_vm1 }
  0x5f   : > { %558 = vmatpush1.bf16.msra.mxu1 %v1844_v6  ;;  %598 = vmatprep.subr.bf16.mxu0 %v1872_v16  ;;  %v1890_v27 = vld [vmem:[#allocation6 + $0x154] ss:$8 sps:$4 sm:$0xff]   ;;  %v1862_v28 = vld [vmem:[#allocation6 + $0x84] ss:$8 sps:$4 sm:$0xff]   ;;  %vm2375_vm4 = vmand %vm202_vm0, %vm208_vm2  ;;  %vm228_vm5 = vcmask 1043456   ;;  %s1754_s8 = sshll.u32 %s2238_s16, 7 }
  0x60   : > { %559 = vmatprep.subr.bf16.mxu1 %v1845_v7  ;;  %v1894_v31 = vld [vmem:[#allocation6 + $0x150] ss:$8 sps:$4 sm:$0xff]   ;;  %v1865_v32 = vld [vmem:[#allocation6 + $0x80] ss:$8 sps:$4 sm:$0xff]   ;;  %v1868_v33 = vld [vmem:[#allocation6 + $0x94] ss:$8 sps:$4 sm:$0xff]   ;;  %s2453_s28 = scalar_lea.hbm %s2500_s3, %s1754_s8 }
  0x61   : > { %v1896_v34 = vld [vmem:[#allocation6 + $0x164] ss:$8 sps:$4 sm:$0xff]   ;;  %v205_v35 = vld [vmem:[#allocation2] sm:$0x1]  ;;  %v2380_v37 = vld [vmem:[%s2359_s7] sm:$0xff]  ;;  %s200_s9 = scalar_lea.vmem [#allocation8], %s1598_s22 }
  0x62   : > { %599 = vmatpush1.bf16.msra.mxu0 %v1876_v18  ;;  %v210_v36 = vld [vmem:[#allocation2 + $0x4] sm:$0x1]  ;;  %v206_v38 = vsel %vm2370_vm3, 0, %v205_v35  ;;  %v1757_v40 = vpack.c.bf16 %v2380_v37, %v2380_v37  ;;  %v1900_v41 = vld [vmem:[#allocation6 + $0x160] ss:$8 sps:$4 sm:$0xff]   ;;  %vm2389_vm6 = vmand %vm228_vm5, %vm208_vm2  ;;  %s1511_s10 = sshll.u32 %s200_s9, 4  ;;  %s2455_s10 = int_to_ptr.vmem [resolvable:$true] %s1511_s10 }
  0x63   : > { %560 = vmatpush1.bf16.msra.mxu1 %v1847_v8  ;;  %600 = vmatprep.subr.bf16.mxu0 %v1878_v19  ;;  %v211_v39 = vsel %vm2375_vm4, 0, %v210_v36  ;;  %207 = vst [vmem:[#allocation2] sm:$0x1] %v206_v38  ;;  %v1871_v42 = vld [vmem:[#allocation6 + $0x90] ss:$8 sps:$4 sm:$0xff]   ;;  %s1498_s29 = scalar_lea.sflag [#allocation5], %s2353_s30 }
  0x64   : > { %561 = vmatprep.subr.bf16.mxu1 %v1848_v10  ;;  %212 = vst [vmem:[#allocation2 + $0x4] sm:$0x1] %v211_v39  ;;  %v1902_v43 = vld [vmem:[#allocation6 + $0x174] ss:$8 sps:$4 sm:$0xff]   ;;  %v219_v44 = vshrl.u32 %v1757_v40, 16  ;;  %v222_v45 = vshll.u32 %v1757_v40, 16 }
  0x65   : > { %v1874_v47 = vld [vmem:[#allocation6 + $0xa4] ss:$8 sps:$4 sm:$0xff]   ;;  %v1877_v48 = vld [vmem:[#allocation6 + $0xa0] ss:$8 sps:$4 sm:$0xff]   ;;  %v1906_v49 = vld [vmem:[#allocation6 + $0x170] ss:$8 sps:$4 sm:$0xff]  }
  0x66   : > { %601 = vmatpush1.bf16.msra.mxu0 %v1882_v21  ;;  %v221_v50 = vrot.slane %v219_v44, 7  ;;  %v1880_v51 = vld [vmem:[#allocation6 + $0xb4] ss:$8 sps:$4 sm:$0xff]   ;;  %v1883_v54 = vld [vmem:[#allocation6 + $0xb0] ss:$8 sps:$4 sm:$0xff]   ;;  %s2119_s23 = scalar_lea.vmem %s2455_s10, 128 }
  0x67   : > { %562 = vmatpush1.bf16.msra.mxu1 %v1850_v13  ;;  %602 = vmatprep.subr.bf16.mxu0 %v1884_v23  ;;  %v1886_v57 = vld [vmem:[#allocation6 + $0xc4] ss:$8 sps:$4 sm:$0xff]   ;;  %v1889_v60 = vld [vmem:[#allocation6 + $0xc0] ss:$8 sps:$4 sm:$0xff]   ;;  %v1892_v61 = vld [vmem:[#allocation6 + $0xd4] ss:$8 sps:$4 sm:$0xff]   ;;  %p2120_p4 = scmp.ne.s32.totalorder %s2455_s10, %s2119_s23 }
  0x68   : > { %563 = vmatprep.subr.bf16.mxu1 %v1851_v14  ;;  %v224_v52 = vor.u32 %v222_v45, %v221_v50  ;;  %v225_v53 = vrot.slane %v221_v50, 4  ;;  %v1895_v62 = vld [vmem:[#allocation6 + $0xd0] ss:$8 sps:$4 sm:$0xff]   ;;  %v1898_v63 = vld [vmem:[#allocation6 + $0xe4] ss:$8 sps:$4 sm:$0xff]   ;;  %s2196_s16 = smov [#allocation8]  }
  0x69   : > { %v1901_v4 = vld [vmem:[#allocation6 + $0xe0] ss:$8 sps:$4 sm:$0xff]   ;;  %v1904_v8 = vld [vmem:[#allocation6 + $0xf4] ss:$8 sps:$4 sm:$0xff]   ;;  %v1907_v10 = vld [vmem:[#allocation6 + $0xf0] ss:$8 sps:$4 sm:$0xff]   ;;  %p2121_p6 = pnand %p2120_p4, %p2308_p12 }
  0x6a   : > { %603 = vmatpush1.bf16.msra.mxu0 %v1888_v26  ;;  %v230_v55 = vld [vmem:[#allocation2] sm:$0xf]  ;;  %v1911_v12 = vld [vmem:[#allocation6 + $0x184] ss:$8 sps:$4 sm:$0xff]   ;;  %v1914_v14 = vld [vmem:[#allocation6 + $0x194] ss:$8 sps:$4 sm:$0xff]  }
  0x6b   : > { %564 = vmatpush1.bf16.msra.mxu1 %v1853_v17  ;;  %604 = vmatprep.subr.bf16.mxu0 %v1890_v27  ;;  %v233_v56 = vld [vmem:[#allocation2 + $0x4] sm:$0x1]  ;;  %v231_v58 = vsel %vm2389_vm6, %v224_v52, %v230_v55  ;;  %v1909_v13 = vld [vmem:[#allocation6 + $0x180] ss:$8 sps:$4 sm:$0xff]   ;;  %v1912_v15 = vld [vmem:[#allocation6 + $0x190] ss:$8 sps:$4 sm:$0xff]   ;;  %p2122_p8 = pneg %p2121_p6 }
  0x6c   : > { %565 = vmatprep.subr.bf16.mxu1 %v1854_v20  ;;  %v234_v59 = vsel %vm2370_vm3, %v225_v53, %v233_v56  ;;  %232 = vst [vmem:[#allocation2] sm:$0xf] %v231_v58  ;;  %v1917_v16 = vld [vmem:[#allocation6 + $0x1a4] ss:$8 sps:$4 sm:$0xff]   ;;  %v1915_v17 = vld [vmem:[#allocation6 + $0x1a0] ss:$8 sps:$4 sm:$0xff]  }
  0x6d   : > { %235 = vst [vmem:[#allocation2 + $0x4] sm:$0x1] %v234_v59  ;;  %v1920_v18 = vld [vmem:[#allocation6 + $0x1b4] ss:$8 sps:$4 sm:$0xff]   ;;  %v1918_v19 = vld [vmem:[#allocation6 + $0x1b0] ss:$8 sps:$4 sm:$0xff]  }
  0x6e   : > { %605 = vmatpush1.bf16.msra.mxu0 %v1894_v31  ;;  %v1923_v20 = vld [vmem:[#allocation6 + $0x1c4] ss:$8 sps:$4 sm:$0xff]   ;;  %v1921_v21 = vld [vmem:[#allocation6 + $0x1c0] ss:$8 sps:$4 sm:$0xff]   ;;  %v1924_v23 = vld [vmem:[#allocation6 + $0x1d0] ss:$8 sps:$4 sm:$0xff]  }
  0x6f   : > { %566 = vmatpush1.bf16.msra.mxu1 %v1856_v22  ;;  %606 = vmatprep.subr.bf16.mxu0 %v1896_v34  ;;  %v1926_v22 = vld [vmem:[#allocation6 + $0x1d4] ss:$8 sps:$4 sm:$0xff]   ;;  %v1930_v27 = vld [vmem:[#allocation6 + $0x1f0] ss:$8 sps:$4 sm:$0xff]   ;;  %v1933_v30 = vld [vmem:[#allocation6 + $0x200] ss:$8 sps:$4 sm:$0xff]  }
  0x70   : > { %567 = vmatprep.subr.bf16.mxu1 %v1857_v24  ;;  %v1929_v24 = vld [vmem:[#allocation6 + $0x1e4] ss:$8 sps:$4 sm:$0xff]   ;;  %v1932_v26 = vld [vmem:[#allocation6 + $0x1f4] ss:$8 sps:$4 sm:$0xff]   ;;  %v1939_v34 = vld [vmem:[#allocation6 + $0x220] ss:$8 sps:$4 sm:$0xff]  }
  0x71   : > { %v1938_v31 = vld [vmem:[#allocation6 + $0x214] ss:$8 sps:$4 sm:$0xff]   ;;  %v1942_v36 = vld [vmem:[#allocation6 + $0x230] ss:$8 sps:$4 sm:$0xff]   ;;  %v1947_v38 = vld [vmem:[#allocation6 + $0x244] ss:$8 sps:$4 sm:$0xff]  }
  0x72   : > { %607 = vmatpush1.bf16.msra.mxu0 %v1900_v41  ;;  %v1944_v35 = vld [vmem:[#allocation6 + $0x234] ss:$8 sps:$4 sm:$0xff]   ;;  %v1945_v39 = vld [vmem:[#allocation6 + $0x240] ss:$8 sps:$4 sm:$0xff]   ;;  %v1948_v41 = vld [vmem:[#allocation6 + $0x250] ss:$8 sps:$4 sm:$0xff]  }
  0x73   : > { %568 = vmatpush1.bf16.msra.mxu1 %v1859_v25  ;;  %608 = vmatprep.subr.bf16.mxu0 %v1902_v43  ;;  %v2397_v1 = vld [vmem:[#allocation2] sm:$0xf]  ;;  %v1950_v40 = vld [vmem:[#allocation6 + $0x254] ss:$8 sps:$4 sm:$0xff]   ;;  %v1954_v45 = vld [vmem:[#allocation6 + $0x270] ss:$8 sps:$4 sm:$0xff]  }
  0x74   : > { %569 = vmatprep.subr.bf16.mxu1 %v1862_v28  ;;  %v237_v2 = vld [vmem:[#allocation2 + $0x4] sm:$0x1]  ;;  %v1927_v25 = vld [vmem:[#allocation6 + $0x1e0] ss:$8 sps:$4 sm:$0xff]   ;;  %v1956_v44 = vld [vmem:[#allocation6 + $0x274] ss:$8 sps:$4 sm:$0xff]  }
  0x75   : > { %v1602_v3 = vcombine.low %v2397_v1, %v237_v2  ;;  %v1935_v28 = vld [vmem:[#allocation6 + $0x204] ss:$8 sps:$4 sm:$0xff]   ;;  %v1951_v43 = vld [vmem:[#allocation6 + $0x260] ss:$8 sps:$4 sm:$0xff]   ;;  %v1987_v50 = vld [vmem:[#allocation6 + $0x314] ss:$8 sps:$4 sm:$0xff]  }
  0x76   : > { %609 = vmatpush1.bf16.msra.mxu0 %v1906_v49  ;;  %v1984_v49 = vld [vmem:[#allocation6 + $0x304] ss:$8 sps:$4 sm:$0xff]   ;;  %v1988_v53 = vld [vmem:[#allocation6 + $0x320] ss:$8 sps:$4 sm:$0xff]   ;;  %s2123_s22 = sshll.u32 %s2196_s16, 4  ;;  %s2124_s22 = int_to_ptr.vmem [resolvable:$false] %s2123_s22 }
  0x77   : > { %570 = vmatpush1.bf16.msra.mxu1 %v1865_v32  ;;  %v244_v5 = vshrl.u32 %v1602_v3, 16  ;;  %v246_v6 = vshll.u32 %v1602_v3, 16  ;;  %v251_v7 = vrot.slane %v1602_v3, 1  ;;  %v1936_v32 = vld [vmem:[#allocation6 + $0x210] ss:$8 sps:$4 sm:$0xff]   ;;  %1407 = vmatprep.subr.bf16.mxu0 %v1984_v49  ;;  %s2125_s6 = scalar_lea.vmem %s2124_s22, 256  ;;  %p2126_p10 = scmp.lt.s32.totalorder %s2455_s10, %s2124_s22 }
  0x78   : > { %571 = vmatprep.subr.bf16.mxu1 %v1868_v33  ;;  %v1941_v33 = vld [vmem:[#allocation6 + $0x224] ss:$8 sps:$4 sm:$0xff]   ;;  %v1979_v49 = vld [vmem:[#allocation6 + $0x2f0] ss:$8 sps:$4 sm:$0xff]   ;;  %v2037_v46 = vld [vmem:[#allocation6 + $0x420] ss:$8 sps:$4 sm:$0xff]   ;;  %p2127_p13 = scmp.lt.s32.totalorder %s2125_s6, %s2119_s23 }
  0x79   : > { %v248_v9 = vrot.slane %v246_v6, 1  ;;  %627 = vmatmul.mubr.bf16.vlgmr.msra.gmra.mrb[0].mxu0 %v251_v7  ;;  %v1990_v52 = vld [vmem:[#allocation6 + $0x324] ss:$8 sps:$4 sm:$0xff]  }
  0x7a   : > { %v2039_v29 = vld [vmem:[#allocation6 + $0x424] ss:$8 sps:$4 sm:$0xff]   ;;  %p2128_p3 = por %p2127_p13, %p2126_p10 }
  0x7b   : > { %572 = vmatpush1.bf16.msra.mxu1 %v1871_v42  ;;  %v249_v11 = vor.u32 %v248_v9, %v244_v5  ;;  %v1953_v42 = vld [vmem:[#allocation6 + $0x264] ss:$8 sps:$4 sm:$0xff]  }
  0x7c   : > { %573 = vmatprep.subr.bf16.mxu1 %v1874_v47  ;;  %v1960_v47 = vld [vmem:[#allocation6 + $0x284] ss:$8 sps:$4 sm:$0xff]   ;;  %p2129_p7 = pnand %p2128_p3, %p2122_p8 }
  0x7d   : > { %585 = vmatprep.mubr.bf16.mxu1 %v249_v11 }
  0x7f   : > { %574 = vmatpush1.bf16.msra.mxu1 %v1877_v48  ;;  %v1982_v48 = vld [vmem:[#allocation6 + $0x300] ss:$8 sps:$4 sm:$0xff]  }
  0x80   : > { %575 = vmatprep.subr.bf16.mxu1 %v1880_v51  ;;  %1408 = vmatpush1.bf16.msra.mxu0 %v1982_v48  ;;  %v1985_v51 = vld [vmem:[#allocation6 + $0x310] ss:$8 sps:$4 sm:$0xff]   ;;  %v1981_v48 = vld [vmem:[#allocation6 + $0x2f4] ss:$8 sps:$4 sm:$0xff]  }
  0x81   : > { %1409 = vmatprep.subr.bf16.mxu0 %v1987_v50 }
  0x83   : > { %576 = vmatpush1.bf16.msra.mxu1 %v1883_v54  ;;  %v303_v54 = vlaneseq }
  0x84   : > { %577 = vmatprep.subr.bf16.mxu1 %v1886_v57  ;;  %1410 = vmatpush1.bf16.msra.mxu0 %v1985_v51  ;;  %v1993_v51 = vld [vmem:[#allocation6 + $0x334] ss:$8 sps:$4 sm:$0xff]  }
  0x85   : > { %1411 = vmatprep.subr.bf16.mxu0 %v1990_v52  ;;  %v304_v56 = vshrl.u32 %v303_v54, 7  ;;  %v1991_v52 = vld [vmem:[#allocation6 + $0x330] ss:$8 sps:$4 sm:$0xff]   ;;  %v1994_v54 = vld [vmem:[#allocation6 + $0x340] ss:$8 sps:$4 sm:$0xff]  }
  0x87   : > { %578 = vmatpush1.bf16.msra.mxu1 %v1889_v60  ;;  %v2401_v60 = vsub.s32 0, %v304_v56 }
  0x88   : > { %579 = vmatprep.subr.bf16.mxu1 %v1892_v61  ;;  %1412 = vmatpush1.bf16.msra.mxu0 %v1988_v53  ;;  %v301_v61 = vld [vmem:[%s2499_s2] sm:$0x3]  ;;  %v1996_v53 = vld [vmem:[#allocation6 + $0x344] ss:$8 sps:$4 sm:$0xff]  }
  0x89   : > { %1413 = vmatprep.subr.bf16.mxu0 %v1993_v51 }
  0x8b   : > { %580 = vmatpush1.bf16.msra.mxu1 %v1895_v62  ;;  %v2406_v62 = vsub.s32 1, %v304_v56  ;;  %v1997_v56 = vld [vmem:[#allocation6 + $0x350] ss:$8 sps:$4 sm:$0xff]  }
  0x8c   : > { %581 = vmatprep.subr.bf16.mxu1 %v1898_v63  ;;  %v306_v63 = vrot.slane %v301_v61, %v2401_v60  ;;  %1414 = vmatpush1.bf16.msra.mxu0 %v1991_v52  ;;  %v2031_v52 = vld [vmem:[#allocation6 + $0x400] ss:$8 sps:$4 sm:$0xff]  }
  0x8d   : > { %v310_v2 = vrot.slane %v301_v61, %v2406_v62  ;;  %1415 = vmatprep.subr.bf16.mxu0 %v1996_v53  ;;  %v2003_v61 = vld [vmem:[#allocation6 + $0x370] ss:$8 sps:$4 sm:$0xff]   ;;  %v2036_v53 = vld [vmem:[#allocation6 + $0x414] ss:$8 sps:$4 sm:$0xff]  }
  0x8f   : > { %582 = vmatpush1.bf16.msra.mxu1 %v1901_v4 }
  0x90   : > { %583 = vmatprep.subr.bf16.mxu1 %v1904_v8  ;;  %1416 = vmatpush1.bf16.msra.mxu0 %v1994_v54  ;;  %v2034_v54 = vld [vmem:[#allocation6 + $0x410] ss:$8 sps:$4 sm:$0xff]  }
  0x93   : > { %584 = vmatpush1.bf16.msra.mxu1 %v1907_v10 }
  0x94   : > { %980 = vmatprep.subr.bf16.mxu1 %v1911_v12 }
  0x96   : > { %586 = vmatmul.mubr.bf16.vlgmr.msra.gmra.mrb[0].mxu1 %v2397_v1 }
  0x97   : > { %981 = vmatpush1.bf16.msra.mxu1 %v1909_v13 }
  0x98   : > { %982 = vmatprep.subr.bf16.mxu1 %v1914_v14 }
  0x9b   : > { %983 = vmatpush1.bf16.msra.mxu1 %v1912_v15 }
  0x9c   : > { %984 = vmatprep.subr.bf16.mxu1 %v1917_v16 }
  0x9f   : > { %985 = vmatpush1.bf16.msra.mxu1 %v1915_v17 }
  0xa0   : > { %986 = vmatprep.subr.bf16.mxu1 %v1920_v18 }
  0xa3   : > { %987 = vmatpush1.bf16.msra.mxu1 %v1918_v19 }
  0xa4   : > { %988 = vmatprep.subr.bf16.mxu1 %v1923_v20 }
  0xa7   : > { %989 = vmatpush1.bf16.msra.mxu1 %v1921_v21 }
  0xa8   : > { %990 = vmatprep.subr.bf16.mxu1 %v1926_v22  ;;  %v658_v22 = vld [vmem:[#allocation2 + $0x4] sm:$0x1] }
  0xab   : > { %991 = vmatpush1.bf16.msra.mxu1 %v1924_v23 }
  0xac   : > { %992 = vmatprep.subr.bf16.mxu1 %v1929_v24 }
  0xaf   : > { %993 = vmatpush1.bf16.msra.mxu1 %v1927_v25 }
  0xb0   : > { %994 = vmatprep.subr.bf16.mxu1 %v1932_v26 }
  0xb3   : > { %995 = vmatpush1.bf16.msra.mxu1 %v1930_v27 }
  0xb4   : > { %996 = vmatprep.subr.bf16.mxu1 %v1935_v28 }
  0xb7   : > { %997 = vmatpush1.bf16.msra.mxu1 %v1933_v30 }
  0xb8   : > { %998 = vmatprep.subr.bf16.mxu1 %v1938_v31 }
  0xbb   : > { %999 = vmatpush1.bf16.msra.mxu1 %v1936_v32 }
  0xbc   : > { %1000 = vmatprep.subr.bf16.mxu1 %v1941_v33 }
  0xbf   : > { %1001 = vmatpush1.bf16.msra.mxu1 %v1939_v34  ;;  %v1958_v34 = vld [vmem:[#allocation6 + $0x280] ss:$8 sps:$4 sm:$0xff]  }
  0xc0   : > { %1002 = vmatprep.subr.bf16.mxu1 %v1944_v35  ;;  %v1963_v35 = vld [vmem:[#allocation6 + $0x294] ss:$8 sps:$4 sm:$0xff]  }
  0xc3   : > { %1003 = vmatpush1.bf16.msra.mxu1 %v1942_v36  ;;  %v1966_v36 = vld [vmem:[#allocation6 + $0x2a4] ss:$8 sps:$4 sm:$0xff]  }
  0xc4   : > { %1004 = vmatprep.subr.bf16.mxu1 %v1947_v38  ;;  %v1964_v38 = vld [vmem:[#allocation6 + $0x2a0] ss:$8 sps:$4 sm:$0xff]  }
  0xc7   : > { %1005 = vmatpush1.bf16.msra.mxu1 %v1945_v39  ;;  %v1969_v39 = vld [vmem:[#allocation6 + $0x2b4] ss:$8 sps:$4 sm:$0xff]  }
  0xc8   : > { %1006 = vmatprep.subr.bf16.mxu1 %v1950_v40  ;;  %v1967_v40 = vld [vmem:[#allocation6 + $0x2b0] ss:$8 sps:$4 sm:$0xff]  }
  0xcb   : > { %1007 = vmatpush1.bf16.msra.mxu1 %v1948_v41  ;;  %v1972_v41 = vld [vmem:[#allocation6 + $0x2c4] ss:$8 sps:$4 sm:$0xff]  }
  0xcc   : > { %1008 = vmatprep.subr.bf16.mxu1 %v1953_v42  ;;  %v1970_v42 = vld [vmem:[#allocation6 + $0x2c0] ss:$8 sps:$4 sm:$0xff]  }
  0xcf   : > { %1009 = vmatpush1.bf16.msra.mxu1 %v1951_v43  ;;  %v1975_v43 = vld [vmem:[#allocation6 + $0x2d4] ss:$8 sps:$4 sm:$0xff]  }
  0xd0   : > { %1010 = vmatprep.subr.bf16.mxu1 %v1956_v44  ;;  %v1973_v44 = vld [vmem:[#allocation6 + $0x2d0] ss:$8 sps:$4 sm:$0xff]  }
  0xd3   : > { %1011 = vmatpush1.bf16.msra.mxu1 %v1954_v45  ;;  %v1978_v45 = vld [vmem:[#allocation6 + $0x2e4] ss:$8 sps:$4 sm:$0xff]  }
  0xd4   : > { %1021 = vmatprep.subr.bf16.mxu1 %v1960_v47  ;;  %v1976_v47 = vld [vmem:[#allocation6 + $0x2e0] ss:$8 sps:$4 sm:$0xff]  }
 0x14c   : > { %v628_v55 = vpop.f32.mrb[0].mxu0 }
 0x14d   : > { %v630_v57 = vpop.f32.mrb[1].mxu0 }
 0x14e   : > { %v632_v58 = vpop.f32.mrb[2].mxu0 }
 0x14f   : > { %v633_v59 = vpop.f32.mrb[3].mxu0  ;;  %v2000_v58 = vld [vmem:[#allocation6 + $0x360] ss:$8 sps:$4 sm:$0xff]  }
 0x150   : > { %v2005_v59 = vld [vmem:[#allocation6 + $0x374] ss:$8 sps:$4 sm:$0xff]  }
 0x169   : > { %v587_v3 = vpop.f32.mrb[0].mxu1 }
 0x16a   : > { %v588_v4 = vadd.f32 %v587_v3, %v306_v63  ;;  %v589_v5 = vpop.f32.mrb[1].mxu1  ;;  %v2008_v63 = vld [vmem:[#allocation6 + $0x384] ss:$8 sps:$4 sm:$0xff]   ;;  %v2011_v3 = vld [vmem:[#allocation6 + $0x394] ss:$8 sps:$4 sm:$0xff]  }
 0x16b   : > { %v590_v6 = vadd.f32 %v589_v5, %v310_v2  ;;  %v591_v7 = vpop.f32.mrb[2].mxu1  ;;  %v2006_v2 = vld [vmem:[#allocation6 + $0x380] ss:$8 sps:$4 sm:$0xff]   ;;  %v2014_v5 = vld [vmem:[#allocation6 + $0x3a4] ss:$8 sps:$4 sm:$0xff]  }
 0x16c   : > { %v629_v8 = vadd.f32 %v628_v55, %v588_v4  ;;  %v592_v9 = vpop.f32.mrb[3].mxu1  ;;  %v1999_v55 = vld [vmem:[#allocation6 + $0x354] ss:$8 sps:$4 sm:$0xff]   ;;  %v2009_v4 = vld [vmem:[#allocation6 + $0x390] ss:$8 sps:$4 sm:$0xff]  }
 0x16d   : > { %v631_v10 = vadd.f32 %v630_v57, %v590_v6  ;;  %1417 = vmatprep.subr.bf16.mxu0 %v1999_v55  ;;  %v2002_v57 = vld [vmem:[#allocation6 + $0x364] ss:$8 sps:$4 sm:$0xff]   ;;  %v2012_v6 = vld [vmem:[#allocation6 + $0x3a0] ss:$8 sps:$4 sm:$0xff]   ;;  %v2017_v7 = vld [vmem:[#allocation6 + $0x3b4] ss:$8 sps:$4 sm:$0xff]  }
 0x16e   : > { %1418 = vmatpush1.bf16.msra.mxu0 %v1997_v56  ;;  %v2020_v9 = vld [vmem:[#allocation6 + $0x3c4] ss:$8 sps:$4 sm:$0xff]   ;;  %v2040_v55 = vld [vmem:[#allocation6 + $0x430] ss:$8 sps:$4 sm:$0xff]  }
 0x16f   : > { %v635_v11 = vmul.f32 0.5, %v631_v10  ;;  %1419 = vmatprep.subr.bf16.mxu0 %v2002_v57  ;;  %v2018_v10 = vld [vmem:[#allocation6 + $0x3c0] ss:$8 sps:$4 sm:$0xff]   ;;  %v2045_v56 = vld [vmem:[#allocation6 + $0x444] ss:$8 sps:$4 sm:$0xff]  }
 0x170   : > { %v2043_v57 = vld [vmem:[#allocation6 + $0x440] ss:$8 sps:$4 sm:$0xff]  }
 0x171   : > { %2055 = vtanh.f32 %v635_v11  ;;  %v2023_v11 = vld [vmem:[#allocation6 + $0x3d4] ss:$8 sps:$4 sm:$0xff]  }
 0x172   : > { %1420 = vmatpush1.bf16.msra.mxu0 %v2000_v58  ;;  %v2048_v58 = vld [vmem:[#allocation6 + $0x454] ss:$8 sps:$4 sm:$0xff]  }
 0x173   : > { %1421 = vmatprep.subr.bf16.mxu0 %v2005_v59  ;;  %v2046_v59 = vld [vmem:[#allocation6 + $0x450] ss:$8 sps:$4 sm:$0xff]  }
 0x176   : > { %1422 = vmatpush1.bf16.msra.mxu0 %v2003_v61  ;;  %v2051_v61 = vld [vmem:[#allocation6 + $0x464] ss:$8 sps:$4 sm:$0xff]  }
 0x177   : > { %1423 = vmatprep.subr.bf16.mxu0 %v2008_v63  ;;  %v2054_v63 = vld [vmem:[#allocation6 + $0x474] ss:$8 sps:$4 sm:$0xff]  }
 0x17a   : > { %1424 = vmatpush1.bf16.msra.mxu0 %v2006_v2  ;;  %v2052_v2 = vld [vmem:[#allocation6 + $0x470] ss:$8 sps:$4 sm:$0xff]  }
 0x17b   : > { %v2056_v12 = vpop.eup %2055  ;;  %1425 = vmatprep.subr.bf16.mxu0 %v2011_v3 }
 0x17c   : > { %v637_v13 = vmul.f32 0.5, %v2056_v12  ;;  %v2021_v12 = vld [vmem:[#allocation6 + $0x3d0] ss:$8 sps:$4 sm:$0xff]  }
 0x17e   : > { %v638_v14 = vadd.f32 0.5, %v637_v13  ;;  %1426 = vmatpush1.bf16.msra.mxu0 %v2009_v4  ;;  %v2026_v13 = vld [vmem:[#allocation6 + $0x3e4] ss:$8 sps:$4 sm:$0xff]  }
 0x17f   : > { %1427 = vmatprep.subr.bf16.mxu0 %v2014_v5  ;;  %v1704_v4 = vld [vmem:[%s2499_s2 + $0x4] sm:$0x3] }
 0x180   : > { %v639_v15 = vmul.f32 %v638_v14, %v629_v8  ;;  %v2015_v8 = vld [vmem:[#allocation6 + $0x3b0] ss:$8 sps:$4 sm:$0xff]   ;;  %v2024_v14 = vld [vmem:[#allocation6 + $0x3e0] ss:$8 sps:$4 sm:$0xff]   ;;  %v1164_v5 = vrot.slane %v1704_v4, %v2406_v62 }
 0x182   : > { %v640_v16 = vadd.f32 %v639_v15, %v2380_v37  ;;  %1428 = vmatpush1.bf16.msra.mxu0 %v2012_v6  ;;  %v2029_v15 = vld [vmem:[#allocation6 + $0x3f4] ss:$8 sps:$4 sm:$0xff]  }
 0x183   : > { %1429 = vmatprep.subr.bf16.mxu0 %v2017_v7 }
 0x184   : > { %v2411_v17 = vmul.f32 0.70710677, %v640_v16  ;;  %v2027_v16 = vld [vmem:[#allocation6 + $0x3f0] ss:$8 sps:$4 sm:$0xff]  }
 0x186   : > { %v1758_v18 = vpack.c.bf16 %v2411_v17, %v2411_v17  ;;  %1430 = vmatpush1.bf16.msra.mxu0 %v2015_v8 }
 0x187   : > { %1431 = vmatprep.subr.bf16.mxu0 %v2020_v9 }
 0x188   : > { %v647_v19 = vshrl.u32 %v1758_v18, 16  ;;  %v650_v21 = vshll.u32 %v1758_v18, 16  ;;  %v2033_v18 = vld [vmem:[#allocation6 + $0x404] ss:$8 sps:$4 sm:$0xff]  }
 0x18a   : > { %v649_v20 = vrot.slane %v647_v19, 7  ;;  %1432 = vmatpush1.bf16.msra.mxu0 %v2018_v10  ;;  %v1653_v19 = vld [vmem:[%s2499_s2 + $0x2] sm:$0x3] }
 0x18b   : > { %1433 = vmatprep.subr.bf16.mxu0 %v2023_v11 }
 0x18c   : > { %v652_v23 = vor.u32 %v650_v21, %v649_v20  ;;  %v653_v24 = vrot.slane %v649_v20, 4  ;;  %v737_v20 = vrot.slane %v1653_v19, %v2406_v62 }
 0x18e   : > { %v656_v25 = vsel %vm2389_vm6, %v652_v23, %v2397_v1  ;;  %v659_v26 = vsel %vm2370_vm3, %v653_v24, %v658_v22  ;;  %v1961_v1 = vld [vmem:[#allocation6 + $0x290] ss:$8 sps:$4 sm:$0xff]   ;;  %1434 = vmatpush1.bf16.msra.mxu0 %v2021_v12  ;;  %v1160_v12 = vrot.slane %v1704_v4, %v2401_v60 }
 0x18f   : > { %657 = vst [vmem:[#allocation2] sm:$0xf] %v656_v25  ;;  %660 = vst [vmem:[#allocation2 + $0x4] sm:$0x1] %v659_v26  ;;  %1435 = vmatprep.subr.bf16.mxu0 %v2026_v13 }
 0x192   : > { %1436 = vmatpush1.bf16.msra.mxu0 %v2024_v14 }
 0x193   : > { %1437 = vmatprep.subr.bf16.mxu0 %v2029_v15 }
 0x196   : > { %v2420_v37 = vld [vmem:[#allocation2] sm:$0xf]  ;;  %v662_v27 = vld [vmem:[#allocation2 + $0x4] sm:$0x1]  ;;  %1438 = vmatpush1.bf16.msra.mxu0 %v2027_v16 }
 0x197   : > { %v1652_v28 = vcombine.low %v2420_v37, %v662_v27  ;;  %1448 = vmatprep.subr.bf16.mxu0 %v2033_v18  ;;  %v733_v27 = vrot.slane %v1653_v19, %v2401_v60 }
 0x199   : > { %v671_v30 = vshll.u32 %v1652_v28, 16  ;;  %v669_v31 = vshrl.u32 %v1652_v28, 16  ;;  %v676_v50 = vrot.slane %v1652_v28, 1 }
 0x19b   : > { %v673_v32 = vrot.slane %v671_v30, 1 }
 0x19d   : > { %v674_v33 = vor.u32 %v673_v32, %v669_v31 }
 0x19f   : > { %1012 = vmatprep.mubr.bf16.mxu1 %v674_v33 }
 0x1a0   : > { %1013 = vmatmul.mubr.bf16.vlgmr.msra.gmra.mrb[4].mxu1 %v2420_v37 }
 0x1a1   : > { %1022 = vmatpush1.bf16.msra.mxu1 %v1958_v34  ;;  %1053 = vmatprep.mubr.bf16.mxu1 %v2195_v0 }
 0x1a2   : > { %1023 = vmatprep.subr.bf16.mxu1 %v1963_v35 }
 0x1a5   : > { %1024 = vmatpush1.bf16.msra.mxu1 %v1961_v1 }
 0x1a6   : > { %1025 = vmatprep.subr.bf16.mxu1 %v1966_v36 }
 0x1a9   : > { %1026 = vmatpush1.bf16.msra.mxu1 %v1964_v38 }
 0x1aa   : > { %1027 = vmatprep.subr.bf16.mxu1 %v1969_v39 }
 0x1ad   : > { %1028 = vmatpush1.bf16.msra.mxu1 %v1967_v40 }
 0x1ae   : > { %1029 = vmatprep.subr.bf16.mxu1 %v1972_v41 }
 0x1b1   : > { %1030 = vmatpush1.bf16.msra.mxu1 %v1970_v42  ;;  %v1085_v42 = vld [vmem:[#allocation2 + $0x4] sm:$0x1] }
 0x1b2   : > { %1031 = vmatprep.subr.bf16.mxu1 %v1975_v43 }
 0x1b5   : > { %1032 = vmatpush1.bf16.msra.mxu1 %v1973_v44 }
 0x1b6   : > { %1033 = vmatprep.subr.bf16.mxu1 %v1978_v45 }
 0x1b9   : > { %1034 = vmatpush1.bf16.msra.mxu1 %v1976_v47 }
 0x1ba   : > { %1035 = vmatprep.subr.bf16.mxu1 %v1981_v48 }
 0x1bd   : > { %1036 = vmatpush1.bf16.msra.mxu1 %v1979_v49 }
 0x1c0   : > { %1054 = vmatmul.mubr.bf16.vlgmr.msra.gmra.mrb[4].mxu1 %v676_v50 }
 0x293   : > { %v1055_v21 = vpop.f32.mrb[4].mxu1 }
 0x294   : > { %v1057_v22 = vpop.f32.mrb[5].mxu1  ;;  %v1764_v31 = vadd.f32 %v1055_v21, %v733_v27 }
 0x295   : > { %v1765_v23 = vadd.f32 %v1057_v22, %v737_v20  ;;  %v1059_v24 = vpop.f32.mrb[6].mxu1 }
 0x296   : > { %v1060_v25 = vpop.f32.mrb[7].mxu1 }
 0x297   : > { %v1062_v26 = vmul.f32 0.5, %v1765_v23 }
 0x299   : > { %2057 = vtanh.f32 %v1062_v26 }
 0x2a3   : > { %v2058_v28 = vpop.eup %2057 }
 0x2a4   : > { %v1064_v30 = vmul.f32 0.5, %v2058_v28 }
 0x2a6   : > { %v1065_v32 = vadd.f32 0.5, %v1064_v30 }
 0x2a8   : > { %v1066_v33 = vmul.f32 %v1764_v31, %v1065_v32 }
 0x2aa   : > { %v1067_v34 = vadd.f32 %v1066_v33, %v2411_v17 }
 0x2ac   : > { %v2431_v35 = vmul.f32 0.70710677, %v1067_v34 }
 0x2ae   : > { %v1759_v1 = vpack.c.bf16 %v2431_v35, %v2431_v35 }
 0x2b0   : > { %v1074_v36 = vshrl.u32 %v1759_v1, 16  ;;  %v1077_v39 = vshll.u32 %v1759_v1, 16 }
 0x2b2   : > { %v1076_v38 = vrot.slane %v1074_v36, 7 }
 0x2b4   : > { %v1079_v40 = vor.u32 %v1077_v39, %v1076_v38  ;;  %v1080_v41 = vrot.slane %v1076_v38, 4 }
 0x2b6   : > { %v1083_v43 = vsel %vm2389_vm6, %v1079_v40, %v2420_v37  ;;  %v1086_v44 = vsel %vm2370_vm3, %v1080_v41, %v1085_v42  ;;  %v2042_v37 = vld [vmem:[#allocation6 + $0x434] ss:$8 sps:$4 sm:$0xff]  }
 0x2b7   : > { %1084 = vst [vmem:[#allocation2] sm:$0xf] %v1083_v43  ;;  %1087 = vst [vmem:[#allocation2 + $0x4] sm:$0x1] %v1086_v44 }
 0x2be   : > { %v1088_v17 = vld [vmem:[#allocation2] sm:$0xf]  ;;  %v1089_v45 = vld [vmem:[#allocation2 + $0x4] sm:$0x1] }
 0x2bf   : > { %v1703_v47 = vcombine.low %v1088_v17, %v1089_v45 }
 0x2c1   : > { %v1098_v48 = vshll.u32 %v1703_v47, 16  ;;  %v1096_v49 = vshrl.u32 %v1703_v47, 16  ;;  %v1103_v3 = vrot.slane %v1703_v47, 1 }
 0x2c3   : > { %v1100_v50 = vrot.slane %v1098_v48, 1 }
 0x2c5   : > { %v1101_v51 = vor.u32 %v1100_v50, %v1096_v49 }
 0x2c7   : > { %1439 = vmatprep.mubr.bf16.mxu0 %v1101_v51 }
 0x2c8   : > { %1440 = vmatmul.mubr.bf16.vlgmr.msra.gmra.mrb[4].mxu0 %v1088_v17 }
 0x2c9   : > { %1449 = vmatpush1.bf16.msra.mxu0 %v2031_v52  ;;  %1480 = vmatprep.mubr.bf16.mxu0 %v2195_v0  ;;  %v2049_v0 = vld [vmem:[#allocation6 + $0x460] ss:$8 sps:$4 sm:$0xff]  }
 0x2ca   : > { %1450 = vmatprep.subr.bf16.mxu0 %v2036_v53 }
 0x2cd   : > { %1451 = vmatpush1.bf16.msra.mxu0 %v2034_v54 }
 0x2ce   : > { %1452 = vmatprep.subr.bf16.mxu0 %v2039_v29 }
 0x2d1   : > { %1453 = vmatpush1.bf16.msra.mxu0 %v2037_v46 }
 0x2d2   : > { %1454 = vmatprep.subr.bf16.mxu0 %v2042_v37 }
 0x2d5   : > { %1455 = vmatpush1.bf16.msra.mxu0 %v2040_v55 }
 0x2d6   : > { %1456 = vmatprep.subr.bf16.mxu0 %v2045_v56 }
 0x2d9   : > { %1457 = vmatpush1.bf16.msra.mxu0 %v2043_v57 }
 0x2da   : > { %1458 = vmatprep.subr.bf16.mxu0 %v2048_v58 }
 0x2dd   : > { %1459 = vmatpush1.bf16.msra.mxu0 %v2046_v59 }
 0x2de   : > { %1460 = vmatprep.subr.bf16.mxu0 %v2051_v61 }
 0x2e1   : > { %1461 = vmatpush1.bf16.msra.mxu0 %v2049_v0 }
 0x2e2   : > { %1462 = vmatprep.subr.bf16.mxu0 %v2054_v63 }
 0x2e5   : > { %1463 = vmatpush1.bf16.msra.mxu0 %v2052_v2 }
 0x2e8   : > { %1481 = vmatmul.mubr.bf16.vlgmr.msra.gmra.mrb[4].mxu0 %v1103_v3 }
 0x3bb   : > { %v1482_v6 = vpop.f32.mrb[4].mxu0 }
 0x3bc   : > { %v1484_v7 = vpop.f32.mrb[5].mxu0  ;;  %v1766_v15 = vadd.f32 %v1482_v6, %v1160_v12 }
 0x3bd   : > { %v1767_v8 = vadd.f32 %v1484_v7, %v1164_v5  ;;  %v1486_v9 = vpop.f32.mrb[6].mxu0 }
 0x3be   : > { %v1487_v10 = vpop.f32.mrb[7].mxu0 }
 0x3bf   : > { %v1489_v11 = vmul.f32 0.5, %v1767_v8 }
 0x3c1   : > { %2059 = vtanh.f32 %v1489_v11 }
 0x3cb   : > { %v2060_v13 = vpop.eup %2059 }
 0x3cc   : > { %v1491_v14 = vmul.f32 0.5, %v2060_v13 }
 0x3ce   : > { %v1492_v16 = vadd.f32 0.5, %v1491_v14 }
 0x3d0   : > { %v1493_v18 = vmul.f32 %v1766_v15, %v1492_v16 }
 0x3d2   : > { %v1494_v62 = vadd.f32 %v1493_v18, %v2431_v35 }
 0x3d4   : > { %v1495_v19 = vmul.f32 0.70710677, %v1494_v62 }
 0x3d6   : > { %1496 = vst [vmem:[%s200_s9] sm:$0xff] %v1495_v19 }
 0x3d7   : > { %2132 = shalt.err (!%p2129_p7)
}
 0x3d8   : > { %s2133_s30 = scalar_lea.hbm %s2453_s28, 128  ;;  %s2137_s20 = scalar_lea.hbm %s2500_s3, 256 }
 0x3d9   : > { %p2134_p9 = scmp.ne.s32.totalorder %s2453_s28, %s2133_s30  ;;  %p2138_p0 = scmp.lt.u32.totalorder %s2453_s28, %s2500_s3 }
 0x3da   : > { %p2139_p11 = scmp.lt.u32.totalorder %s2137_s20, %s2133_s30  ;;  %p2141_p4 = scmp.lt.u32.totalorder %s2133_s30, %s2453_s28 }
 0x3db   : > { %p2135_p2 = pnand %p2134_p9, %p2308_p12 }
 0x3dc   : > { %p2140_p1 = por %p2139_p11, %p2138_p0 }
 0x3dd   : > { %p2136_p5 = pneg %p2135_p2 }
 0x3de   : > { %p2142_p6 = por %p2141_p4, %p2140_p1 }
 0x3e0   : > { %p2143_p8 = pnand %p2142_p6, %p2136_p5 }
 0x3e2   : > { %2146 = shalt.err (!%p2143_p8)
}
 0x3e3   : > { %1782 = dma.vmem_to_hbm [thread:$0]  (%p2308_p12), %s2455_s10, 128, %s2453_s28, %s1498_s29  }
 0x3e4 PF: > { %s1523_s26 = sand.u32 1, %s2177_s12   ;;  %p2521_p10 = scmp.ne.s32.totalorder %s2505_s19, 0 }
 0x3e5   : > { %p2522_p13 = scmp.ge.s32.totalorder %s2189_s15, 2  ;;  %s1524_s5 = scalar_lea.sflag [#allocation5], %s1523_s26 }
 0x3e7   : > { %p1793_p3 = pnand %p2522_p13, %p2521_p10 }
 0x3e9   : > { %2172 = dma.done.wait (!%p1793_p3), %s1524_s5, 128  }
 0x3ea   : > { %2174 = vsyncadd (!%p1793_p3), %s1524_s5, 4294967168  ;;  %p17_p7 = scmp.ge.s32.totalorder %s2273_s24, 4   ;;  %s2523_s12 = smov %s2181_s13 }
 0x3eb   : > { %s2524_s13 = smov %s2185_s14  ;;  %s2525_s14 = smov %s2304_s17 }
 0x3ec   : > { %s2526_s15 = smov %s2273_s24  ;;  %19 = sbr.rel (!%p17_p7) target bundleno = 6 (0x6), region = 85 }
 0x3f3   :  { %1529 = vsyncpa [#allocation4], 1 }
 0x3f4   :  { %1531 = vsyncpa [#allocation4 + $0x1], 1 }
 0x3f5   :  { %1532 = vsyncpa [#allocation7], 1 }
 0x3f6   :  { %1533 = vsyncpa [#allocation5], 1 }
 0x3f7   :  { %1535 = vsyncpa [#allocation5 + $0x1], 1 }

</bundles_post_ra>
